<compile_context>
chip_gen: v5e
topology: v5e:2x2
jax: 0.10.0
libtpu: 0.0.40
codegen_flags: <defaults>
</compile_context>

<pallas_src>
import math
from functools import partial

import jax
import jax.numpy as jnp
from jax.experimental import pallas as pl
from jax.experimental.pallas import tpu as pltpu

# Above the 16/32 MiB scoped defaults on v5e/v6e, below v7x's 64 MiB physical.
_VMEM_LIMIT = 48 * 1024 * 1024


def _round_up(x, m):
    return ((x + m - 1) // m) * m


def _choose_spt(ns, b_rows, row_target=256):
    """Samples per row tile: ROW_TILE = spt * b_rows is a multiple of 8."""
    unit = 8 // math.gcd(b_rows, 8)
    spt = max(unit, (max(1, row_target // b_rows) // unit) * unit)
    spt = min(spt, _round_up(ns, unit))
    return spt


def _resident(shape):
    """Whole-array block with a constant index_map -> stays resident in VMEM."""
    zeros = (0,) * len(shape)
    return pl.BlockSpec(shape, lambda i, _z=zeros: _z)


# ----------------------------------------------------------------------------
# Kernel 1: encoder MLP + summarizer + future-offset add + sample-independent
#           decoder-layer-1 terms.  Runs once (grid of 1).
# ----------------------------------------------------------------------------
def _encoder_kernel(x_ref, oe_ref, r_ref,
                    we1_ref, be1_ref, we2_ref, be2_ref,
                    ws1_ref, bs1_ref, ws2_ref, bs2_ref,
                    wr_ref, wrep_ref, bd1_ref,
                    rep_ref, base_ref):
    f32 = jnp.float32
    bf16 = jnp.bfloat16
    # EncoderMLP.mlp : Linear -> ReLU -> Linear
    h = jnp.maximum(
        jnp.dot(x_ref[...], we1_ref[...], preferred_element_type=f32) + be1_ref[...], 0.0)
    emb = jnp.dot(h.astype(bf16), we2_ref[...], preferred_element_type=f32) + be2_ref[...]
    # EncoderMLP.summarizer : Linear -> ReLU -> Linear
    h2 = jnp.maximum(
        jnp.dot(emb.astype(bf16), ws1_ref[...], preferred_element_type=f32) + bs1_ref[...], 0.0)
    summary = jnp.dot(h2.astype(bf16), ws2_ref[...], preferred_element_type=f32) + bs2_ref[...]
    # FutureOffsetEncoder (dropout p=0 -> identity)
    rep = summary + oe_ref[...]
    rep_ref[...] = rep.astype(rep_ref.dtype)
    # decoder layer-1 contributions that do not depend on the latent sample
    base_ref[...] = (
        jnp.dot(rep.astype(bf16), wrep_ref[...], preferred_element_type=f32)
        + jnp.dot(r_ref[...], wr_ref[...], preferred_element_type=f32)
        + bd1_ref[...]).astype(base_ref.dtype)


# ----------------------------------------------------------------------------
# Kernel 2: row-batched decoder.  Grid over row tiles of (ns_pad*B) rows.
# ----------------------------------------------------------------------------
def _decoder_kernel(half, out_w, out_w_pad,
                    z_ref, base_ref, wz_ref, wd2_ref, bd2_ref, out_ref):
    f32 = jnp.float32
    zw = jnp.dot(z_ref[...], wz_ref[...], preferred_element_type=f32)
    h1 = jnp.maximum(zw + base_ref[...], 0.0)                 # (ROW_TILE, dec_nhid)
    y = jnp.dot(h1.astype(jnp.bfloat16), wd2_ref[...],
                preferred_element_type=f32) + bd2_ref[...]    # (ROW_TILE, out_w_pad)
    # columns are permuted in the wrapper: [mu (half) | sigma (half) | zero pad]
    out_ref[:, :half] = y[:, :half].astype(out_ref.dtype)
    ys = y[:, half:out_w]
    sp = jnp.maximum(ys, 0.0) + jnp.log1p(jnp.exp(-jnp.abs(ys)))   # stable softplus
    out_ref[:, half:out_w] = (0.1 + 0.9 * sp).astype(out_ref.dtype)
    if out_w < out_w_pad:
        out_ref[:, out_w:] = y[:, out_w:].astype(out_ref.dtype)    # zeros (padded W/b)


# ----------------------------------------------------------------------------
# Forward pass (Pallas)
# ----------------------------------------------------------------------------
def forward_pallas(params, observed, offset, z, r_context, *, future_len,
                   row_tile_target=256):
    f32, bf16 = jnp.float32, jnp.bfloat16
    s, b, p, d = observed.shape
    B = b * p
    ns, _, z_dim = z.shape
    we1, be1, we2, be2 = params["enc_mlp"]
    ws1, bs1, ws2, bs2 = params["enc_sum"]
    wd1, bd1, wd2, bd2 = params["decoder"]
    enc_nout = ws2.shape[1]
    dec_nhid = wd1.shape[1]
    out_w = wd2.shape[1]                      # future_len * d * 2
    half = future_len * d
    out_w_pad = _round_up(out_w, 128)         # lane-dense output slab

    # decoder layer-1 weight split: rows ordered [W_z ; W_r ; W_rep]
    if r_context is not None:
        r_dim = r_context.shape[-1]
        r_ctx = r_context.astype(bf16)
    else:
        r_dim = 0
        r_ctx = jnp.zeros((B, 1), bf16)
    wz = wd1[:z_dim].astype(bf16)
    wr = (wd1[z_dim:z_dim + r_dim].astype(bf16) if r_dim > 0
          else jnp.zeros((1, dec_nhid), bf16))
    wrep = wd1[z_dim + r_dim:].astype(bf16)

    # permute decoder output columns so mu / sigma are contiguous halves,
    # then pad the lane dim up to a multiple of 128
    cols = jnp.arange(out_w).reshape(future_len, 2, d)
    perm = jnp.concatenate([cols[:, 0, :].reshape(-1), cols[:, 1, :].reshape(-1)])
    wd2p = jnp.pad(wd2[:, perm], ((0, 0), (0, out_w_pad - out_w))).astype(bf16)
    bd2p = jnp.pad(bd2[:, perm], ((0, 0), (0, out_w_pad - out_w))).astype(f32)

    # ---- plain-JAX layout glue mirroring the reference .view()/.permute() ----
    x_enc = observed.reshape(s, B, d).transpose(1, 0, 2).reshape(B, s * d).astype(bf16)
    offsets = jnp.repeat(offset, p)                       # repeat_interleave
    oe_rows = params["oe"][offsets].astype(f32)           # (B, enc_nout)

    # ---------------- kernel 1: one-shot encoder + base terms ----------------
    enc_in = [x_enc, oe_rows, r_ctx,
              we1.astype(bf16), be1.astype(f32), we2.astype(bf16), be2.astype(f32),
              ws1.astype(bf16), bs1.astype(f32), ws2.astype(bf16), bs2.astype(f32),
              wr, wrep, bd1.astype(f32)]
    rep, base = pl.pallas_call(
        _encoder_kernel,
        grid=(1,),
        in_specs=[_resident(a.shape) for a in enc_in],
        out_specs=(pl.BlockSpec((B, enc_nout), lambda i: (0, 0)),
                   pl.BlockSpec((B, dec_nhid), lambda i: (0, 0))),
        out_shape=(jax.ShapeDtypeStruct((B, enc_nout), f32),
                   jax.ShapeDtypeStruct((B, dec_nhid), f32)),
        compiler_params=pltpu.CompilerParams(
            dimension_semantics=("arbitrary",),
            vmem_limit_bytes=_VMEM_LIMIT),
    )(*enc_in)

    # ---------------- kernel 2: row-batched, parallel decoder ----------------
    # z row pairing reproduces torch z.repeat(1, npeople, 1): row n*B+j <- z[n, j % b]
    z_rows = jnp.tile(z, (1, p, 1)).astype(bf16)          # (ns, B, z_dim)
    spt = _choose_spt(ns, B, row_tile_target)             # samples per row tile
    ns_pad = _round_up(ns, spt)
    if ns_pad != ns:
        z_rows = jnp.pad(z_rows, ((0, ns_pad - ns), (0, 0), (0, 0)))
    z_rows = z_rows.reshape(ns_pad * B, z_dim)
    row_tile = spt * B                                     # multiple of 8 by construction
    num_tiles = ns_pad // spt
    # replicate base once per row tile (tiles start at sample boundaries)
    base_tile = jnp.tile(base, (spt, 1))                   # (row_tile, dec_nhid) f32

    flops = 2 * ns_pad * B * (z_dim * dec_nhid + dec_nhid * out_w_pad)
    bytes_accessed = (z_rows.size * 2 + base_tile.size * 4 + wz.size * 2
                      + wd2p.size * 2 + bd2p.size * 4 + ns_pad * B * out_w_pad * 4)
    cost = pl.CostEstimate(flops=int(flops),
                           transcendentals=int(2 * ns_pad * B * half),
                           bytes_accessed=int(bytes_accessed))

    dec_out = pl.pallas_call(
        partial(_decoder_kernel, half, out_w, out_w_pad),
        grid=(num_tiles,),
        in_specs=[pl.BlockSpec((row_tile, z_dim), lambda i: (i, 0)),
                  _resident((row_tile, dec_nhid)),
                  _resident((z_dim, dec_nhid)),
                  _resident((dec_nhid, out_w_pad)),
                  _resident((1, out_w_pad))],
        out_specs=pl.BlockSpec((row_tile, out_w_pad), lambda i: (i, 0)),
        out_shape=jax.ShapeDtypeStruct((ns_pad * B, out_w_pad), f32),
        compiler_params=pltpu.CompilerParams(
            dimension_semantics=("parallel",),
            vmem_limit_bytes=_VMEM_LIMIT),
        cost_estimate=cost,
    )(z_rows, base_tile, wz, wd2p, bd2p)

    # ---- layout-only epilogue (sigma transform already applied in-kernel) ---
    decoded = dec_out[:ns * B, :out_w].reshape(ns, b, p, 2, future_len, d)
    mu = jnp.transpose(decoded[:, :, :, 0], (0, 3, 1, 2, 4))      # (ns, fl, b, p, d)
    sigma = jnp.transpose(decoded[:, :, :, 1], (0, 3, 1, 2, 4))
    return mu, sigma, rep[None]                                    # rep: (1, B, enc_nout)


# ----------------------------------------------------------------------------
# Pure-JAX reference (mirrors the PyTorch module exactly)
# ----------------------------------------------------------------------------
def forward_ref(params, observed, offset, z, r_context, future_len, *,
                bf16_matmul=True):
    if bf16_matmul:
        mm = lambda a, w: jnp.dot(a.astype(jnp.bfloat16), w.astype(jnp.bfloat16),
                                  preferred_element_type=jnp.float32)
    else:
        mm = lambda a, w: jnp.dot(a, w)
    mlp = lambda x, w1, b1, w2, b2: mm(jnp.maximum(mm(x, w1) + b1, 0.0), w2) + b2

    s, b, p, d = observed.shape
    B = b * p
    x = observed.reshape(s, B, d).transpose(1, 0, 2).reshape(B, s * d)
    emb = mlp(x, *params["enc_mlp"])
    summary = mlp(emb, *params["enc_sum"])
    encoded = summary[None]
    offsets = jnp.repeat(offset, p)
    rep = encoded + params["oe"][offsets][None]
    ns = z.shape[0]
    zc = jnp.tile(z, (1, p, 1))
    if r_context is not None:
        rc = jnp.broadcast_to(r_context[None], (ns,) + r_context.shape)
        zc = jnp.concatenate([zc, rc], axis=-1)
    dec_in = jnp.concatenate(
        [zc, jnp.broadcast_to(rep, (ns, B, rep.shape[-1]))], axis=-1)
    decoded = mlp(dec_in.reshape(ns * B, -1), *params["decoder"])
    decoded = decoded.reshape(ns, b, p, future_len, d * 2)
    decoded = jnp.transpose(decoded, (0, 3, 1, 2, 4))
    mu = decoded[..., :d]
    sigma = 0.1 + 0.9 * jax.nn.softplus(decoded[..., d:])
    return mu, sigma, rep


# ----------------------------------------------------------------------------
# Parameter construction (deterministic)
# ----------------------------------------------------------------------------
def init_linear(key, fan_in, fan_out):
    kw, kb = jax.random.split(key)
    bound = 1.0 / math.sqrt(fan_in)
    w = jax.random.uniform(kw, (fan_in, fan_out), jnp.float32, -bound, bound)
    b = jax.random.uniform(kb, (1, fan_out), jnp.float32, -bound, bound)
    return w, b


def make_offset_table(max_len, nembed):
    pos = jnp.arange(max_len, dtype=jnp.float32)[:, None]
    div = jnp.exp(jnp.arange(0, nembed, 2, dtype=jnp.float32)
                  * (-math.log(10000.0) / nembed))
    oe = jnp.zeros((max_len, nembed), jnp.float32)
    oe = oe.at[:, 0::2].set(jnp.sin(pos * div))
    oe = oe.at[:, 1::2].set(jnp.cos(pos * div))
    return oe


def make_params(key, *, seq_len, data_dim, enc_nout, enc_nhid,
                z_dim, r_dim, future_len, dec_nhid, max_len=2000):
    k = jax.random.split(key, 6)
    dec_in = z_dim + r_dim + enc_nout
    return {
        # EncoderMLP.mlp : MLP(seq*d -> seq*nout) with hidden enc_nhid
        "enc_mlp": (*init_linear(k[0], seq_len * data_dim, enc_nhid),
                    *init_linear(k[1], enc_nhid, seq_len * enc_nout)),
        # EncoderMLP.summarizer : MLP(seq*nout -> nout) with hidden nout
        "enc_sum": (*init_linear(k[2], seq_len * enc_nout, enc_nout),
                    *init_linear(k[3], enc_nout, enc_nout)),
        # decoder : MLP(dec_in -> future_len*d*2) with hidden dec_nhid
        "decoder": (*init_linear(k[4], dec_in, dec_nhid),
                    *init_linear(k[5], dec_nhid, future_len * data_dim * 2)),
        # FutureOffsetEncoder buffer (dropout p=0 -> identity)
        "oe": make_offset_table(max_len, enc_nout),
    }


# ----------------------------------------------------------------------------
if __name__ == "__main__":
    seq_len, batch, npeople, data_dim = 8, 2, 3, 4
    future_len = 4
    enc_nout, enc_nhid = 16, 32          # enc_nout even (sinusoidal offsets)
    z_dim, r_dim = 8, 6
    dec_nhid = 32
    nsamples = 5

    key = jax.random.PRNGKey(0)
    kp, ko, kz, kr = jax.random.split(key, 4)

    params = make_params(kp, seq_len=seq_len, data_dim=data_dim,
                         enc_nout=enc_nout, enc_nhid=enc_nhid,
                         z_dim=z_dim, r_dim=r_dim,
                         future_len=future_len, dec_nhid=dec_nhid)

    observed = jax.random.normal(ko, (seq_len, batch, npeople, data_dim),
                                 jnp.float32)
    offset = jnp.array([1, 3], dtype=jnp.int32)                 # (batch,)
    z = jax.random.normal(kz, (nsamples, batch, z_dim), jnp.float32)
    r_context = jax.random.normal(kr, (batch * npeople, r_dim), jnp.float32)

    fwd = jax.jit(forward_pallas, static_argnames=("future_len",))
    mu, sigma, rep = fwd(params, observed, offset, z, r_context,
                         future_len=future_len)
    jax.block_until_ready((mu, sigma, rep))

    # bf16-matmul-emulating reference (same arithmetic as the kernels)
    mu_r, sigma_r, rep_r = forward_ref(params, observed, offset, z, r_context,
                                       future_len, bf16_matmul=True)
    # full-f32 reference for a looser sanity check
    mu_f, sigma_f, rep_f = forward_ref(params, observed, offset, z, r_context,
                                       future_len, bf16_matmul=False)

    assert mu.shape == (nsamples, future_len, batch, npeople, data_dim)
    assert sigma.shape == mu.shape
    assert rep.shape == (1, batch * npeople, enc_nout)
    assert jnp.allclose(mu, mu_r, atol=1e-2, rtol=1e-2)
    assert jnp.allclose(sigma, sigma_r, atol=1e-2, rtol=1e-2)
    assert jnp.allclose(rep, rep_r, atol=1e-2, rtol=1e-2)
    assert jnp.allclose(mu, mu_f, atol=1.5e-1, rtol=1.5e-1)
    assert jnp.allclose(sigma, sigma_f, atol=1.5e-1, rtol=1.5e-1)
    assert bool(jnp.all(sigma > 0.0))

    print("KERNEL_OK")
</pallas_src>

<mosaic_0001>
module attributes {stable_mosaic.version = 11 : i64} {
  func.func @_encoder_kernel(%arg0: i32, %arg1: memref<6x32xbf16, #tpu.memory_space<vmem>>, %arg2: memref<6x16xf32, #tpu.memory_space<vmem>>, %arg3: memref<6x6xbf16, #tpu.memory_space<vmem>>, %arg4: memref<32x32xbf16, #tpu.memory_space<vmem>>, %arg5: memref<1x32xf32, #tpu.memory_space<vmem>>, %arg6: memref<32x128xbf16, #tpu.memory_space<vmem>>, %arg7: memref<1x128xf32, #tpu.memory_space<vmem>>, %arg8: memref<128x16xbf16, #tpu.memory_space<vmem>>, %arg9: memref<1x16xf32, #tpu.memory_space<vmem>>, %arg10: memref<16x16xbf16, #tpu.memory_space<vmem>>, %arg11: memref<1x16xf32, #tpu.memory_space<vmem>>, %arg12: memref<6x32xbf16, #tpu.memory_space<vmem>>, %arg13: memref<16x32xbf16, #tpu.memory_space<vmem>>, %arg14: memref<1x32xf32, #tpu.memory_space<vmem>>, %arg15: memref<6x16xf32, #tpu.memory_space<vmem>>, %arg16: memref<6x32xf32, #tpu.memory_space<vmem>>) attributes {dimension_semantics = [#tpu.dimension_semantics<arbitrary>], iteration_bounds = array<i64: 1>, scalar_prefetch = 0 : i64, scratch_operands = 0 : i64, tpu.core_type = #tpu.core_type<tc>, window_params = [{pipeline_mode = #tpu.pipeline_mode<synchronous>, transform_indices = @transform_0, window_bounds = array<i64: 6, 32>}, {pipeline_mode = #tpu.pipeline_mode<synchronous>, transform_indices = @transform_1, window_bounds = array<i64: 6, 16>}, {pipeline_mode = #tpu.pipeline_mode<synchronous>, transform_indices = @transform_2, window_bounds = array<i64: 6, 6>}, {pipeline_mode = #tpu.pipeline_mode<synchronous>, transform_indices = @transform_3, window_bounds = array<i64: 32, 32>}, {pipeline_mode = #tpu.pipeline_mode<synchronous>, transform_indices = @transform_4, window_bounds = array<i64: 1, 32>}, {pipeline_mode = #tpu.pipeline_mode<synchronous>, transform_indices = @transform_5, window_bounds = array<i64: 32, 128>}, {pipeline_mode = #tpu.pipeline_mode<synchronous>, transform_indices = @transform_6, window_bounds = array<i64: 1, 128>}, {pipeline_mode = #tpu.pipeline_mode<synchronous>, transform_indices = @transform_7, window_bounds = array<i64: 128, 16>}, {pipeline_mode = #tpu.pipeline_mode<synchronous>, transform_indices = @transform_8, window_bounds = array<i64: 1, 16>}, {pipeline_mode = #tpu.pipeline_mode<synchronous>, transform_indices = @transform_9, window_bounds = array<i64: 16, 16>}, {pipeline_mode = #tpu.pipeline_mode<synchronous>, transform_indices = @transform_10, window_bounds = array<i64: 1, 16>}, {pipeline_mode = #tpu.pipeline_mode<synchronous>, transform_indices = @transform_11, window_bounds = array<i64: 6, 32>}, {pipeline_mode = #tpu.pipeline_mode<synchronous>, transform_indices = @transform_12, window_bounds = array<i64: 16, 32>}, {pipeline_mode = #tpu.pipeline_mode<synchronous>, transform_indices = @transform_13, window_bounds = array<i64: 1, 32>}, {pipeline_mode = #tpu.pipeline_mode<synchronous>, transform_indices = @transform_14, window_bounds = array<i64: 6, 16>}, {pipeline_mode = #tpu.pipeline_mode<synchronous>, transform_indices = @transform_15, window_bounds = array<i64: 6, 32>}]} {
    %c0 = arith.constant 0 : index
    %c0_0 = arith.constant 0 : index
    %0 = vector.load %arg1[%c0, %c0_0] : memref<6x32xbf16, #tpu.memory_space<vmem>>, vector<6x32xbf16>
    %c0_1 = arith.constant 0 : index
    %c0_2 = arith.constant 0 : index
    %1 = vector.load %arg4[%c0_1, %c0_2] : memref<32x32xbf16, #tpu.memory_space<vmem>>, vector<32x32xbf16>
    %cst = arith.constant dense<0.000000e+00> : vector<6x32xf32>
    %2 = tpu.matmul %0, %1, %cst {dimension_numbers = #tpu.dot_dimension_numbers<[1], [0], [0], [1], [0, 0, 1, 1], [], []>} : vector<6x32xbf16>, vector<32x32xbf16>, vector<6x32xf32> -> vector<6x32xf32>
    %c0_3 = arith.constant 0 : index
    %c0_4 = arith.constant 0 : index
    %3 = vector.load %arg5[%c0_3, %c0_4] : memref<1x32xf32, #tpu.memory_space<vmem>>, vector<1x32xf32>
    %4 = vector.broadcast %3 : vector<1x32xf32> to vector<6x32xf32>
    %5 = arith.addf %2, %4 : vector<6x32xf32>
    %cst_5 = arith.constant 0.000000e+00 : f32
    %6 = vector.broadcast %cst_5 : f32 to vector<6x32xf32>
    %7 = arith.maximumf %5, %6 : vector<6x32xf32>
    %8 = arith.truncf %7 : vector<6x32xf32> to vector<6x32xbf16>
    %c0_6 = arith.constant 0 : index
    %c0_7 = arith.constant 0 : index
    %9 = vector.load %arg6[%c0_6, %c0_7] : memref<32x128xbf16, #tpu.memory_space<vmem>>, vector<32x128xbf16>
    %cst_8 = arith.constant dense<0.000000e+00> : vector<6x128xf32>
    %10 = tpu.matmul %8, %9, %cst_8 {dimension_numbers = #tpu.dot_dimension_numbers<[1], [0], [0], [1], [0, 0, 1, 1], [], []>} : vector<6x32xbf16>, vector<32x128xbf16>, vector<6x128xf32> -> vector<6x128xf32>
    %c0_9 = arith.constant 0 : index
    %c0_10 = arith.constant 0 : index
    %11 = vector.load %arg7[%c0_9, %c0_10] : memref<1x128xf32, #tpu.memory_space<vmem>>, vector<1x128xf32>
    %12 = vector.broadcast %11 : vector<1x128xf32> to vector<6x128xf32>
    %13 = arith.addf %10, %12 : vector<6x128xf32>
    %14 = arith.truncf %13 : vector<6x128xf32> to vector<6x128xbf16>
    %c0_11 = arith.constant 0 : index
    %c0_12 = arith.constant 0 : index
    %15 = vector.load %arg8[%c0_11, %c0_12] : memref<128x16xbf16, #tpu.memory_space<vmem>>, vector<128x16xbf16>
    %cst_13 = arith.constant dense<0.000000e+00> : vector<6x16xf32>
    %16 = tpu.matmul %14, %15, %cst_13 {dimension_numbers = #tpu.dot_dimension_numbers<[1], [0], [0], [1], [0, 0, 1, 1], [], []>} : vector<6x128xbf16>, vector<128x16xbf16>, vector<6x16xf32> -> vector<6x16xf32>
    %c0_14 = arith.constant 0 : index
    %c0_15 = arith.constant 0 : index
    %17 = vector.load %arg9[%c0_14, %c0_15] : memref<1x16xf32, #tpu.memory_space<vmem>>, vector<1x16xf32>
    %18 = vector.broadcast %17 : vector<1x16xf32> to vector<6x16xf32>
    %19 = arith.addf %16, %18 : vector<6x16xf32>
    %cst_16 = arith.constant 0.000000e+00 : f32
    %20 = vector.broadcast %cst_16 : f32 to vector<6x16xf32>
    %21 = arith.maximumf %19, %20 : vector<6x16xf32>
    %22 = arith.truncf %21 : vector<6x16xf32> to vector<6x16xbf16>
    %c0_17 = arith.constant 0 : index
    %c0_18 = arith.constant 0 : index
    %23 = vector.load %arg10[%c0_17, %c0_18] : memref<16x16xbf16, #tpu.memory_space<vmem>>, vector<16x16xbf16>
    %cst_19 = arith.constant dense<0.000000e+00> : vector<6x16xf32>
    %24 = tpu.matmul %22, %23, %cst_19 {dimension_numbers = #tpu.dot_dimension_numbers<[1], [0], [0], [1], [0, 0, 1, 1], [], []>} : vector<6x16xbf16>, vector<16x16xbf16>, vector<6x16xf32> -> vector<6x16xf32>
    %c0_20 = arith.constant 0 : index
    %c0_21 = arith.constant 0 : index
    %25 = vector.load %arg11[%c0_20, %c0_21] : memref<1x16xf32, #tpu.memory_space<vmem>>, vector<1x16xf32>
    %26 = vector.broadcast %25 : vector<1x16xf32> to vector<6x16xf32>
    %27 = arith.addf %24, %26 : vector<6x16xf32>
    %c0_22 = arith.constant 0 : index
    %c0_23 = arith.constant 0 : index
    %28 = vector.load %arg2[%c0_22, %c0_23] : memref<6x16xf32, #tpu.memory_space<vmem>>, vector<6x16xf32>
    %29 = arith.addf %27, %28 : vector<6x16xf32>
    %c0_24 = arith.constant 0 : index
    %c0_25 = arith.constant 0 : index
    %30 = vector.load %arg15[%c0_24, %c0_25] : memref<6x16xf32, #tpu.memory_space<vmem>>, vector<6x16xf32>
    tpu.vector_store %arg15[%c0_24, %c0_25], %29 {strides = array<i32>} : memref<6x16xf32, #tpu.memory_space<vmem>>, vector<6x16xf32>,
    %31 = arith.truncf %29 : vector<6x16xf32> to vector<6x16xbf16>
    %c0_26 = arith.constant 0 : index
    %c0_27 = arith.constant 0 : index
    %32 = vector.load %arg13[%c0_26, %c0_27] : memref<16x32xbf16, #tpu.memory_space<vmem>>, vector<16x32xbf16>
    %cst_28 = arith.constant dense<0.000000e+00> : vector<6x32xf32>
    %33 = tpu.matmul %31, %32, %cst_28 {dimension_numbers = #tpu.dot_dimension_numbers<[1], [0], [0], [1], [0, 0, 1, 1], [], []>} : vector<6x16xbf16>, vector<16x32xbf16>, vector<6x32xf32> -> vector<6x32xf32>
    %c0_29 = arith.constant 0 : index
    %c0_30 = arith.constant 0 : index
    %34 = vector.load %arg3[%c0_29, %c0_30] : memref<6x6xbf16, #tpu.memory_space<vmem>>, vector<6x6xbf16>
    %c0_31 = arith.constant 0 : index
    %c0_32 = arith.constant 0 : index
    %35 = vector.load %arg12[%c0_31, %c0_32] : memref<6x32xbf16, #tpu.memory_space<vmem>>, vector<6x32xbf16>
    %cst_33 = arith.constant dense<0.000000e+00> : vector<6x32xf32>
    %36 = tpu.matmul %34, %35, %cst_33 {dimension_numbers = #tpu.dot_dimension_numbers<[1], [0], [0], [1], [0, 0, 1, 1], [], []>} : vector<6x6xbf16>, vector<6x32xbf16>, vector<6x32xf32> -> vector<6x32xf32>
    %37 = arith.addf %33, %36 : vector<6x32xf32>
    %c0_34 = arith.constant 0 : index
    %c0_35 = arith.constant 0 : index
    %38 = vector.load %arg14[%c0_34, %c0_35] : memref<1x32xf32, #tpu.memory_space<vmem>>, vector<1x32xf32>
    %39 = vector.broadcast %38 : vector<1x32xf32> to vector<6x32xf32>
    %40 = arith.addf %37, %39 : vector<6x32xf32>
    %c0_36 = arith.constant 0 : index
    %c0_37 = arith.constant 0 : index
    %41 = vector.load %arg16[%c0_36, %c0_37] : memref<6x32xf32, #tpu.memory_space<vmem>>, vector<6x32xf32>
    tpu.vector_store %arg16[%c0_36, %c0_37], %40 {strides = array<i32>} : memref<6x32xf32, #tpu.memory_space<vmem>>, vector<6x32xf32>,
    return
  }
  func.func @transform_0(%arg0: i32) -> (i32, i32) {
    %c0_i32 = arith.constant 0 : i32
    %c0_i32_0 = arith.constant 0 : i32
    %c0_i32_1 = arith.constant 0 : i32
    return %c0_i32, %c0_i32_0 : i32, i32
  }
  func.func @transform_1(%arg0: i32) -> (i32, i32) {
    %c0_i32 = arith.constant 0 : i32
    %c0_i32_0 = arith.constant 0 : i32
    %c0_i32_1 = arith.constant 0 : i32
    return %c0_i32, %c0_i32_0 : i32, i32
  }
  func.func @transform_2(%arg0: i32) -> (i32, i32) {
    %c0_i32 = arith.constant 0 : i32
    %c0_i32_0 = arith.constant 0 : i32
    %c0_i32_1 = arith.constant 0 : i32
    return %c0_i32, %c0_i32_0 : i32, i32
  }
  func.func @transform_3(%arg0: i32) -> (i32, i32) {
    %c0_i32 = arith.constant 0 : i32
    %c0_i32_0 = arith.constant 0 : i32
    %c0_i32_1 = arith.constant 0 : i32
    return %c0_i32, %c0_i32_0 : i32, i32
  }
  func.func @transform_4(%arg0: i32) -> (i32, i32) {
    %c0_i32 = arith.constant 0 : i32
    %c0_i32_0 = arith.constant 0 : i32
    %c0_i32_1 = arith.constant 0 : i32
    return %c0_i32, %c0_i32_0 : i32, i32
  }
  func.func @transform_5(%arg0: i32) -> (i32, i32) {
    %c0_i32 = arith.constant 0 : i32
    %c0_i32_0 = arith.constant 0 : i32
    %c0_i32_1 = arith.constant 0 : i32
    return %c0_i32, %c0_i32_0 : i32, i32
  }
  func.func @transform_6(%arg0: i32) -> (i32, i32) {
    %c0_i32 = arith.constant 0 : i32
    %c0_i32_0 = arith.constant 0 : i32
    %c0_i32_1 = arith.constant 0 : i32
    return %c0_i32, %c0_i32_0 : i32, i32
  }
  func.func @transform_7(%arg0: i32) -> (i32, i32) {
    %c0_i32 = arith.constant 0 : i32
    %c0_i32_0 = arith.constant 0 : i32
    %c0_i32_1 = arith.constant 0 : i32
    return %c0_i32, %c0_i32_0 : i32, i32
  }
  func.func @transform_8(%arg0: i32) -> (i32, i32) {
    %c0_i32 = arith.constant 0 : i32
    %c0_i32_0 = arith.constant 0 : i32
    %c0_i32_1 = arith.constant 0 : i32
    return %c0_i32, %c0_i32_0 : i32, i32
  }
  func.func @transform_9(%arg0: i32) -> (i32, i32) {
    %c0_i32 = arith.constant 0 : i32
    %c0_i32_0 = arith.constant 0 : i32
    %c0_i32_1 = arith.constant 0 : i32
    return %c0_i32, %c0_i32_0 : i32, i32
  }
  func.func @transform_10(%arg0: i32) -> (i32, i32) {
    %c0_i32 = arith.constant 0 : i32
    %c0_i32_0 = arith.constant 0 : i32
    %c0_i32_1 = arith.constant 0 : i32
    return %c0_i32, %c0_i32_0 : i32, i32
  }
  func.func @transform_11(%arg0: i32) -> (i32, i32) {
    %c0_i32 = arith.constant 0 : i32
    %c0_i32_0 = arith.constant 0 : i32
    %c0_i32_1 = arith.constant 0 : i32
    return %c0_i32, %c0_i32_0 : i32, i32
  }
  func.func @transform_12(%arg0: i32) -> (i32, i32) {
    %c0_i32 = arith.constant 0 : i32
    %c0_i32_0 = arith.constant 0 : i32
    %c0_i32_1 = arith.constant 0 : i32
    return %c0_i32, %c0_i32_0 : i32, i32
  }
  func.func @transform_13(%arg0: i32) -> (i32, i32) {
    %c0_i32 = arith.constant 0 : i32
    %c0_i32_0 = arith.constant 0 : i32
    %c0_i32_1 = arith.constant 0 : i32
    return %c0_i32, %c0_i32_0 : i32, i32
  }
  func.func @transform_14(%arg0: i32) -> (i32, i32) {
    %c0_i32 = arith.constant 0 : i32
    %c0_i32_0 = arith.constant 0 : i32
    %c0_i32_1 = arith.constant 0 : i32
    return %c0_i32, %c0_i32_0 : i32, i32
  }
  func.func @transform_15(%arg0: i32) -> (i32, i32) {
    %c0_i32 = arith.constant 0 : i32
    %c0_i32_0 = arith.constant 0 : i32
    %c0_i32_1 = arith.constant 0 : i32
    return %c0_i32, %c0_i32_0 : i32, i32
  }
}

module attributes {stable_mosaic.version = 11 : i64} {
  func.func @_decoder_kernel(%arg0: i32, %arg1: memref<48x8xbf16, #tpu.memory_space<vmem>>, %arg2: memref<48x32xf32, #tpu.memory_space<vmem>>, %arg3: memref<8x32xbf16, #tpu.memory_space<vmem>>, %arg4: memref<32x128xbf16, #tpu.memory_space<vmem>>, %arg5: memref<1x128xf32, #tpu.memory_space<vmem>>, %arg6: memref<48x128xf32, #tpu.memory_space<vmem>>) attributes {dimension_semantics = [#tpu.dimension_semantics<parallel>], iteration_bounds = array<i64: 1>, scalar_prefetch = 0 : i64, scratch_operands = 0 : i64, tpu.core_type = #tpu.core_type<tc>, window_params = [{transform_indices = @transform_0, window_bounds = array<i64: 48, 8>}, {pipeline_mode = #tpu.pipeline_mode<synchronous>, transform_indices = @transform_1, window_bounds = array<i64: 48, 32>}, {pipeline_mode = #tpu.pipeline_mode<synchronous>, transform_indices = @transform_2, window_bounds = array<i64: 8, 32>}, {pipeline_mode = #tpu.pipeline_mode<synchronous>, transform_indices = @transform_3, window_bounds = array<i64: 32, 128>}, {pipeline_mode = #tpu.pipeline_mode<synchronous>, transform_indices = @transform_4, window_bounds = array<i64: 1, 128>}, {transform_indices = @transform_5, window_bounds = array<i64: 48, 128>}]} {
    %c0 = arith.constant 0 : index
    %c0_0 = arith.constant 0 : index
    %0 = vector.load %arg1[%c0, %c0_0] : memref<48x8xbf16, #tpu.memory_space<vmem>>, vector<48x8xbf16>
    %c0_1 = arith.constant 0 : index
    %c0_2 = arith.constant 0 : index
    %1 = vector.load %arg3[%c0_1, %c0_2] : memref<8x32xbf16, #tpu.memory_space<vmem>>, vector<8x32xbf16>
    %cst = arith.constant dense<0.000000e+00> : vector<48x32xf32>
    %2 = tpu.matmul %0, %1, %cst {dimension_numbers = #tpu.dot_dimension_numbers<[1], [0], [0], [1], [0, 0, 1, 1], [], []>} : vector<48x8xbf16>, vector<8x32xbf16>, vector<48x32xf32> -> vector<48x32xf32>
    %c0_3 = arith.constant 0 : index
    %c0_4 = arith.constant 0 : index
    %3 = vector.load %arg2[%c0_3, %c0_4] : memref<48x32xf32, #tpu.memory_space<vmem>>, vector<48x32xf32>
    %4 = arith.addf %2, %3 : vector<48x32xf32>
    %cst_5 = arith.constant 0.000000e+00 : f32
    %5 = vector.broadcast %cst_5 : f32 to vector<48x32xf32>
    %6 = arith.maximumf %4, %5 : vector<48x32xf32>
    %7 = arith.truncf %6 : vector<48x32xf32> to vector<48x32xbf16>
    %c0_6 = arith.constant 0 : index
    %c0_7 = arith.constant 0 : index
    %8 = vector.load %arg4[%c0_6, %c0_7] : memref<32x128xbf16, #tpu.memory_space<vmem>>, vector<32x128xbf16>
    %cst_8 = arith.constant dense<0.000000e+00> : vector<48x128xf32>
    %9 = tpu.matmul %7, %8, %cst_8 {dimension_numbers = #tpu.dot_dimension_numbers<[1], [0], [0], [1], [0, 0, 1, 1], [], []>} : vector<48x32xbf16>, vector<32x128xbf16>, vector<48x128xf32> -> vector<48x128xf32>
    %c0_9 = arith.constant 0 : index
    %c0_10 = arith.constant 0 : index
    %10 = vector.load %arg5[%c0_9, %c0_10] : memref<1x128xf32, #tpu.memory_space<vmem>>, vector<1x128xf32>
    %11 = vector.broadcast %10 : vector<1x128xf32> to vector<48x128xf32>
    %12 = arith.addf %9, %11 : vector<48x128xf32>
    %13 = vector.extract_strided_slice %12 {offsets = [0, 0], sizes = [48, 16], strides = [1, 1]} : vector<48x128xf32> to vector<48x16xf32>
    %c0_11 = arith.constant 0 : index
    %c0_12 = arith.constant 0 : index
    %14 = vector.load %arg6[%c0_11, %c0_12] : memref<48x128xf32, #tpu.memory_space<vmem>>, vector<48x16xf32>
    tpu.vector_store %arg6[%c0_11, %c0_12], %13 {strides = array<i32>} : memref<48x128xf32, #tpu.memory_space<vmem>>, vector<48x16xf32>,
    %15 = vector.extract_strided_slice %12 {offsets = [0, 16], sizes = [48, 16], strides = [1, 1]} : vector<48x128xf32> to vector<48x16xf32>
    %cst_13 = arith.constant 0.000000e+00 : f32
    %16 = vector.broadcast %cst_13 : f32 to vector<48x16xf32>
    %17 = arith.maximumf %15, %16 : vector<48x16xf32>
    %18 = math.absf %15 : vector<48x16xf32>
    %cst_14 = arith.constant 0.000000e+00 : f32
    %19 = vector.broadcast %cst_14 : f32 to vector<48x16xf32>
    %20 = arith.subf %19, %18 : vector<48x16xf32>
    %21 = math.exp %20 : vector<48x16xf32>
    %22 = math.log1p %21 : vector<48x16xf32>
    %23 = arith.addf %17, %22 : vector<48x16xf32>
    %cst_15 = arith.constant 0.899999976 : f32
    %24 = vector.broadcast %cst_15 : f32 to vector<48x16xf32>
    %25 = arith.mulf %24, %23 : vector<48x16xf32>
    %cst_16 = arith.constant 1.000000e-01 : f32
    %26 = vector.broadcast %cst_16 : f32 to vector<48x16xf32>
    %27 = arith.addf %26, %25 : vector<48x16xf32>
    %c0_17 = arith.constant 0 : index
    %c16 = arith.constant 16 : index
    %28 = vector.load %arg6[%c0_17, %c16] : memref<48x128xf32, #tpu.memory_space<vmem>>, vector<48x16xf32>
    tpu.vector_store %arg6[%c0_17, %c16], %27 {strides = array<i32>} : memref<48x128xf32, #tpu.memory_space<vmem>>, vector<48x16xf32>,
    %29 = vector.extract_strided_slice %12 {offsets = [0, 32], sizes = [48, 96], strides = [1, 1]} : vector<48x128xf32> to vector<48x96xf32>
    %c0_18 = arith.constant 0 : index
    %c32 = arith.constant 32 : index
    %30 = vector.load %arg6[%c0_18, %c32] : memref<48x128xf32, #tpu.memory_space<vmem>>, vector<48x96xf32>
    tpu.vector_store %arg6[%c0_18, %c32], %29 {strides = array<i32>} : memref<48x128xf32, #tpu.memory_space<vmem>>, vector<48x96xf32>,
    return
  }
  func.func @transform_0(%arg0: i32) -> (i32, i32) {
    %c0_i32 = arith.constant 0 : i32
    %c0_i32_0 = arith.constant 0 : i32
    return %arg0, %c0_i32 : i32, i32
  }
  func.func @transform_1(%arg0: i32) -> (i32, i32) {
    %c0_i32 = arith.constant 0 : i32
    %c0_i32_0 = arith.constant 0 : i32
    %c0_i32_1 = arith.constant 0 : i32
    return %c0_i32, %c0_i32_0 : i32, i32
  }
  func.func @transform_2(%arg0: i32) -> (i32, i32) {
    %c0_i32 = arith.constant 0 : i32
    %c0_i32_0 = arith.constant 0 : i32
    %c0_i32_1 = arith.constant 0 : i32
    return %c0_i32, %c0_i32_0 : i32, i32
  }
  func.func @transform_3(%arg0: i32) -> (i32, i32) {
    %c0_i32 = arith.constant 0 : i32
    %c0_i32_0 = arith.constant 0 : i32
    %c0_i32_1 = arith.constant 0 : i32
    return %c0_i32, %c0_i32_0 : i32, i32
  }
  func.func @transform_4(%arg0: i32) -> (i32, i32) {
    %c0_i32 = arith.constant 0 : i32
    %c0_i32_0 = arith.constant 0 : i32
    %c0_i32_1 = arith.constant 0 : i32
    return %c0_i32, %c0_i32_0 : i32, i32
  }
  func.func @transform_5(%arg0: i32) -> (i32, i32) {
    %c0_i32 = arith.constant 0 : i32
    %c0_i32_0 = arith.constant 0 : i32
    return %arg0, %c0_i32 : i32, i32
  }
}

</mosaic_0001>

<bundles_post_ra>
// kernel: tile.19
= control target key start
LH: loop header
LB: loop body
LE: loop exit
PB: predicated region body
PF: predicated region fallthrough
CT: control target
= control target key end

     0   :  { %vm3_vm0 = vcmask 261120   ;;  %s120_s0 = inlined_call_operand.vmem [shape: f32[8,6,32], index: 0, kind: input, shape index: {}]   ;;  %s121_s1 = inlined_call_operand.vmem [shape: f32[48,32], index: 1, kind: output, shape index: {}]  }
   0x1   :  { %v2_v0 = vld [vmem:[%s120_s0] sm:$0x3f]   ;;  %v40_v1 = vld [vmem:[%s120_s0 + $0x8] sm:$0x3f]   ;;  %v42_v2 = vld [vmem:[%s120_s0 + $0x10] sm:$0x3f]  }
   0x2   :  { %4 = vst.msk [vmem:[%s121_s1] sm:$0x3f] %vm3_vm0, %v2_v0   ;;  %v44_v3 = vld [vmem:[%s120_s0 + $0x18] sm:$0x3f]   ;;  %v46_v4 = vld [vmem:[%s120_s0 + $0x20] sm:$0x3f]  }
   0x3   :  { %41 = vst.msk [vmem:[%s121_s1 + $0x6] sm:$0x3f] %vm3_vm0, %v40_v1   ;;  %v48_v5 = vld [vmem:[%s120_s0 + $0x28] sm:$0x3f]   ;;  %v50_v6 = vld [vmem:[%s120_s0 + $0x30] sm:$0x3f]  }
   0x4   :  { %43 = vst.msk [vmem:[%s121_s1 + $0xc] sm:$0x3f] %vm3_vm0, %v42_v2   ;;  %v52_v7 = vld [vmem:[%s120_s0 + $0x38] sm:$0x3f]  }
   0x5   :  { %45 = vst.msk [vmem:[%s121_s1 + $0x12] sm:$0x3f] %vm3_vm0, %v44_v3  }
   0x6   :  { %47 = vst.msk [vmem:[%s121_s1 + $0x18] sm:$0x3f] %vm3_vm0, %v46_v4  }
   0x7   :  { %49 = vst.msk [vmem:[%s121_s1 + $0x1e] sm:$0x3f] %vm3_vm0, %v48_v5  }
   0x8   :  { %51 = vst.msk [vmem:[%s121_s1 + $0x24] sm:$0x3f] %vm3_vm0, %v50_v6  }
   0x9   :  { %53 = vst.msk [vmem:[%s121_s1 + $0x2a] sm:$0x3f] %vm3_vm0, %v52_v7  }

// kernel: forward_pallas.2
= control target key start
LH: loop header
LB: loop body
LE: loop exit
PB: predicated region body
PF: predicated region fallthrough
CT: control target
= control target key end

     0   :  { %vm71_vm0 = vcmask 261120   ;;  %vm252_vm1 = vcmask 1042432   ;;  %vm222_vm2 = vcmask 130048   ;;  %vm248_vm3 = vcmask 48128   ;;  %s545_s3 = inlined_call_operand.vmem [shape: bf16[32,32], index: 3, kind: input, shape index: {}]   ;;  %s546_s4 = inlined_call_operand.vmem [shape: f32[1,32], index: 4, kind: input, shape index: {}]   ;;  %s547_s0 = inlined_call_operand.vmem [shape: bf16[6,32], index: 0, kind: input, shape index: {}]   ;;  %s548_s6 = inlined_call_operand.vmem [shape: f32[1,128], index: 6, kind: input, shape index: {}]   ;;  %s549_s5 = inlined_call_operand.vmem [shape: bf16[32,128], index: 5, kind: input, shape index: {}]   ;;  %s550_s7 = inlined_call_operand.vmem [shape: bf16[128,16], index: 7, kind: input, shape index: {}]   ;;  %s551_s8 = inlined_call_operand.vmem [shape: f32[1,16], index: 8, kind: input, shape index: {}]   ;;  %s552_s10 = inlined_call_operand.vmem [shape: f32[1,16], index: 10, kind: input, shape index: {}]   ;;  %s553_s9 = inlined_call_operand.vmem [shape: bf16[16,16], index: 9, kind: input, shape index: {}]   ;;  %s554_s11 = inlined_call_operand.vmem [shape: bf16[6,32], index: 11, kind: input, shape index: {}]   ;;  %s555_s12 = inlined_call_operand.vmem [shape: bf16[16,32], index: 12, kind: input, shape index: {}]   ;;  %s556_s2 = inlined_call_operand.vmem [shape: bf16[6,6], index: 2, kind: input, shape index: {}]   ;;  %s557_s13 = inlined_call_operand.vmem [shape: f32[1,32], index: 13, kind: input, shape index: {}]   ;;  %s558_s1 = inlined_call_operand.vmem [shape: f32[6,16], index: 1, kind: input, shape index: {}]   ;;  %s559_s14 = inlined_call_operand.vmem [shape: f32[6,16], index: 14, kind: output, shape index: {0}]   ;;  %s560_s15 = inlined_call_operand.vmem [shape: f32[6,32], index: 15, kind: output, shape index: {1}]  }
   0x1   :  { %v368_v0 = vld [vmem:[%s545_s3 + $0x8] sm:$0xff]  ;;  %v367_v1 = vld [vmem:[%s545_s3] sm:$0xff]  ;;  %v378_v5 = vld [vmem:[%s550_s7 + $0x38] sm:$0xff]  ;;  %vm241_vm4 = vcmask 128000   ;;  %vm296_vm5 = vcmask 259072  }
   0x2   :  { %81 = vmatpush.bf16.msra.mxu0 %v368_v0  ;;  %v50_v2 = vld [vmem:[%s547_s0] sm:$0x7]  ;;  %v370_v3 = vld [vmem:[%s549_s5 + $0x8] sm:$0xff]  ;;  %195 = vmatpush.bf16.msra.mxu2 %v378_v5  ;;  %v377_v6 = vld [vmem:[%s550_s7 + $0x30] sm:$0xff] }
   0x3   :  { %119 = vmatpush.bf16.msra.mxu1 %v370_v3  ;;  %v369_v4 = vld [vmem:[%s549_s5] sm:$0xff]  ;;  %v376_v7 = vld [vmem:[%s550_s7 + $0x28] sm:$0xff]  ;;  %v374_v9 = vld [vmem:[%s550_s7 + $0x18] sm:$0xff] }
   0x4   :  { %v375_v8 = vld [vmem:[%s550_s7 + $0x20] sm:$0xff]  ;;  %v373_v10 = vld [vmem:[%s550_s7 + $0x10] sm:$0xff]  ;;  %v372_v12 = vld [vmem:[%s550_s7 + $0x8] sm:$0xff] }
   0x5   :  { %v381_v11 = vld [vmem:[%s546_s4] ss:$0 sm:$0xff] }
   0x6   :  { %82 = vmatpush.bf16.msra.mxu0 %v367_v1  ;;  %196 = vmatpush.bf16.msra.mxu2 %v377_v6  ;;  %v371_v18 = vld [vmem:[%s550_s7] sm:$0xff] }
   0x7   :  { %120 = vmatpush.bf16.msra.mxu1 %v369_v4  ;;  %v382_v19 = vld [vmem:[%s548_s6] ss:$0 sm:$0xff] }
   0x8   :  { %v379_v24 = vld [vmem:[%s553_s9] sm:$0xff] }
   0x9   :  { %314 = vmatmul.msk.bf16.vlgmr.msra.gmra.mxu0 %vm71_vm0, %v50_v2  ;;  %233 = vmatpush.bf16.msra.mxu3 %v379_v24  ;;  %v247_v25 = vld [vmem:[%s554_s11] sm:$0x7] }
   0xa   :  { %197 = vmatpush.bf16.msra.mxu2 %v376_v7  ;;  %v380_v26 = vld [vmem:[%s555_s12] sm:$0xff]  ;;  %v254_v27 = vsel %vm252_vm1, %v247_v25, 0 }
   0xb   :  { %285 = vmatpush.bf16.msrb.mxu0 %v380_v26  ;;  %v383_v28 = vld [vmem:[%s551_s8] ss:$0 sm:$0xff] }
   0xc   :  { %v246_v34 = vld [vmem:[%s556_s2] sm:$0x7] }
   0xd   :  { %263 = vmatpush.bf16.msrb.mxu3 %v254_v27  ;;  %v384_v35 = vld [vmem:[%s552_s10] ss:$0 sm:$0xff] }
   0xe   :  { %198 = vmatpush.bf16.msra.mxu2 %v375_v8  ;;  %v239_v37 = vld [vmem:[%s558_s1] sm:$0x3f] }
   0xf   :  { %v385_v44 = vld [vmem:[%s557_s13] ss:$0 sm:$0xff] }
  0x12   :  { %199 = vmatpush.bf16.msra.mxu2 %v374_v9 }
  0x16   :  { %200 = vmatpush.bf16.msra.mxu2 %v373_v10 }
  0x1a   :  { %201 = vmatpush.bf16.msra.mxu2 %v372_v12 }
  0x1e   :  { %202 = vmatpush.bf16.msra.mxu2 %v371_v18 }
  0x86   :  { %v84_v13 = vpop.f32.mrf.mxu0 }
  0x87   :  { %v85_v14 = vadd.f32 %v381_v11, %v84_v13 }
  0x89   :  { %v88_v15 = vmax.f32 %v85_v14, 0.0 }
  0x8b   :  { %v89_v16 = vpack.c.bf16 %v88_v15, %v88_v15 }
  0x8d   :  { %323 = vmatmul.msk.bf16.vlgmr.msra.gmra.mxu1 %vm71_vm0, %v89_v16 }
  0x8e   :  { %v86_v17 = vpop.f32.mrf.mxu0 }
 0x10a   :  { %v122_v20 = vpop.f32.mrf.mxu1 }
 0x10b   :  { %v123_v21 = vadd.f32 %v382_v19, %v122_v20 }
 0x10d   :  { %v126_v22 = vpack.c.bf16 %v123_v21, %v123_v21 }
 0x10f   :  { %203 = vmatmul.bf16.vlgmr.msra.gmra.mxu2 %v126_v22 }
 0x112   :  { %v124_v23 = vpop.f32.mrf.mxu1 }
 0x192   :  { %v204_v29 = vpop.f32.mrf.mxu2 }
 0x193   :  { %v205_v30 = vadd.f32 %v383_v28, %v204_v29 }
 0x195   :  { %v208_v31 = vmax.f32 %v205_v30, 0.0 }
 0x197   :  { %v209_v32 = vpack.c.bf16 %v208_v31, %v208_v31 }
 0x199   :  { %360 = vmatmul.msk.bf16.vlgmr.msra.gmra.mxu3 %vm222_vm2, %v209_v32 }
 0x19a   :  { %v206_v33 = vpop.f32.mrf.mxu2 }
 0x1a9   :  { %361 = vmatmul.msk.bf16.vlgmr.msrb.gmra.mxu3 %vm248_vm3, %v246_v34 }
 0x21c   :  { %v235_v36 = vpop.f32.mrf.mxu3 }
 0x21d   :  { %v236_v38 = vadd.f32 %v384_v35, %v235_v36 }
 0x21f   :  { %v240_v39 = vadd.f32 %v239_v37, %v236_v38 }
 0x221   :  { %242 = vst.msk [vmem:[%s559_s14] sm:$0x3f] %vm241_vm4, %v240_v39  ;;  %v243_v40 = vpack.c.bf16 %v240_v39, %v240_v39 }
 0x223   :  { %366 = vmatmul.msk.bf16.vlgmr.msrb.gmra.mxu0 %vm222_vm2, %v243_v40 }
 0x224   :  { %v237_v41 = vpop.f32.mrf.mxu3 }
 0x22c   :  { %v265_v42 = vpop.f32.mrf.mxu3 }
 0x234   :  { %v267_v43 = vpop.f32.mrf.mxu3 }
 0x2a0   :  { %v287_v45 = vpop.f32.mrf.mxu0 }
 0x2a1   :  { %v288_v46 = vadd.f32 %v287_v45, %v265_v42 }
 0x2a3   :  { %v295_v47 = vadd.f32 %v385_v44, %v288_v46 }
 0x2a5   :  { %297 = vst.msk [vmem:[%s560_s15] sm:$0x3f] %vm296_vm5, %v295_v47 }
 0x2a8   :  { %v289_v48 = vpop.f32.mrf.mxu0 }

// kernel: forward_pallas.3
= control target key start
LH: loop header
LB: loop body
LE: loop exit
PB: predicated region body
PF: predicated region fallthrough
CT: control target
= control target key end

     0   :  { %vm59_vm0 = vcmask 1043456   ;;  %vm49_vm1 = vcmask 64512   ;;  %vm116_vm2 = vcmask 261120   ;;  %vm150_vm3 = vcmask 130048   ;;  %s520_s2 = inlined_call_operand.vmem [shape: bf16[8,32], index: 2, kind: input, shape index: {}]   ;;  %s521_s0 = inlined_call_operand.vmem [shape: bf16[48,8], index: 0, kind: input, shape index: {}]   ;;  %s522_s4 = inlined_call_operand.vmem [shape: f32[1,128], index: 4, kind: input, shape index: {}]   ;;  %s523_s3 = inlined_call_operand.vmem [shape: bf16[32,128], index: 3, kind: input, shape index: {}]   ;;  %s524_s1 = inlined_call_operand.vmem [shape: f32[48,32], index: 1, kind: input, shape index: {}]   ;;  %s525_s5 = inlined_call_operand.vmem [shape: f32[48,128], index: 5, kind: output, shape index: {}]  }
   0x1   :  { %v27_v0 = vld [vmem:[%s520_s2] sm:$0xf]  ;;  %v304_v3 = vld [vmem:[%s521_s0 + $0x8] sm:$0xff]  ;;  %v305_v4 = vld [vmem:[%s521_s0 + $0x10] sm:$0xff]  ;;  %vm259_vm5 = vcmask 261248   ;;  %vm266_vm6 = vcmask 1047808  }
   0x2   :  { %v61_v1 = vsel %vm59_vm0, %v27_v0, 0  ;;  %v303_v2 = vld [vmem:[%s521_s0] sm:$0xff]  ;;  %v307_v5 = vld [vmem:[%s523_s3 + $0x8] sm:$0xff]  ;;  %v30_v15 = vld [vmem:[%s524_s1 + $0x10] sm:$0xff] }
   0x3   :  { %70 = vmatpush.bf16.msra.mxu0 %v61_v1  ;;  %308 = vmatpush.bf16.msra.mxu3 %v61_v1  ;;  %v306_v6 = vld [vmem:[%s523_s3] sm:$0xff]  ;;  %v29_v11 = vld [vmem:[%s524_s1 + $0x8] sm:$0xff]  ;;  %v31_v17 = vld [vmem:[%s524_s1 + $0x18] sm:$0xff] }
   0x4   :  { %309 = vmatpush.bf16.msra.mxu1 %v307_v5  ;;  %310 = vmatpush.bf16.msra.mxu2 %v307_v5  ;;  %v28_v8 = vld [vmem:[%s524_s1] sm:$0xff]  ;;  %v33_v27 = vld [vmem:[%s524_s1 + $0x28] sm:$0xff] }
   0x5   :  { %v32_v26 = vld [vmem:[%s524_s1 + $0x20] sm:$0xff] }
   0x6   :  { %289 = vmatmul.msk.bf16.vlgmr.msra.gmra.mxu0 %vm49_vm1, %v303_v2  ;;  %290 = vmatmul.msk.bf16.vlgmr.msra.gmra.mxu3 %vm49_vm1, %v304_v3  ;;  %v410_v34 = vld [vmem:[%s522_s4] ss:$0 sm:$0xff] }
   0x7   :  { %132 = vmatpush.bf16.msrb.mxu0 %v307_v5 }
   0x8   :  { %311 = vmatpush.bf16.msra.mxu1 %v306_v6  ;;  %312 = vmatpush.bf16.msra.mxu2 %v306_v6 }
   0xb   :  { %133 = vmatpush.bf16.msrb.mxu0 %v306_v6 }
  0x16   :  { %291 = vmatmul.msk.bf16.gmra.mxu3 %vm49_vm1, %v305_v4 }
  0x83   :  { %v72_v7 = vpop.f32.mrf.mxu0 }
  0x84   :  { %v73_v9 = vadd.f32 %v72_v7, %v28_v8 }
  0x86   :  { %v87_v13 = vmax.f32 %v73_v9, 0.0 }
  0x89   :  { %v77_v10 = vpop.f32.mrf.mxu3 }
  0x8a   :  { %v78_v18 = vadd.f32 %v77_v10, %v30_v15 }
  0x8b   :  { %v74_v12 = vpop.f32.mrf.mxu0 }
  0x8c   :  { %v75_v14 = vadd.f32 %v74_v12, %v29_v11  ;;  %v89_v22 = vmax.f32 %v78_v18, 0.0 }
  0x8e   :  { %v88_v16 = vmax.f32 %v75_v14, 0.0 }
  0x90   :  { %v93_v19 = vpack.c.bf16 %v88_v16, %v87_v13 }
  0x91   :  { %v79_v20 = vpop.f32.mrf.mxu3 }
  0x92   :  { %v80_v21 = vadd.f32 %v79_v20, %v31_v17  ;;  %300 = vmatmul.msk.bf16.vlgmr.msrb.gmra.mxu0 %vm116_vm2, %v93_v19 }
  0x94   :  { %v90_v23 = vmax.f32 %v80_v21, 0.0 }
  0x96   :  { %v94_v24 = vpack.c.bf16 %v90_v23, %v89_v22 }
  0x98   :  { %301 = vmatmul.msk.bf16.vlgmr.msra.gmra.mxu1 %vm116_vm2, %v94_v24 }
  0x99   :  { %v82_v25 = vpop.f32.mrf.mxu3 }
  0x9a   :  { %v83_v28 = vadd.f32 %v82_v25, %v32_v26 }
  0x9c   :  { %v91_v31 = vmax.f32 %v83_v28, 0.0 }
  0xa1   :  { %v84_v29 = vpop.f32.mrf.mxu3 }
  0xa2   :  { %v85_v30 = vadd.f32 %v84_v29, %v33_v27 }
  0xa4   :  { %v92_v32 = vmax.f32 %v85_v30, 0.0 }
  0xa6   :  { %v95_v33 = vpack.c.bf16 %v92_v32, %v91_v31 }
  0xa8   :  { %302 = vmatmul.msk.bf16.vlgmr.msra.gmra.mxu2 %vm116_vm2, %v95_v33 }
 0x10f   :  { %v135_v35 = vpop.f32.mrf.mxu0 }
 0x110   :  { %v413_v36 = vadd.f32 %v410_v34, %v135_v35 }
 0x112   :  { %151 = vst.msk [vmem:[%s525_s5] sm:$0xff] %vm150_vm3, %v413_v36  ;;  %v163_v37 = vand.u32 2147483647, %v413_v36  ;;  %v157_v5 = vmax.f32 %v413_v36, 0.0 }
 0x114   :  { %v169_v38 = vsub.f32 0.0, %v163_v37 }
 0x115   :  { %v140_v39 = vpop.f32.mrf.mxu1 }
 0x116   :  { %v175_v40 = vmul.f32 1.442695, %v169_v38  ;;  %v422_v41 = vadd.f32 %v410_v34, %v140_v39 }
 0x117   :  { %v137_v42 = vpop.f32.mrf.mxu0 }
 0x118   :  { %314 = vpow2.f32 %v175_v40  ;;  %153 = vst.msk [vmem:[%s525_s5 + $0x10] sm:$0xff] %vm150_vm3, %v422_v41  ;;  %v165_v43 = vand.u32 2147483647, %v422_v41  ;;  %v431_v44 = vadd.f32 %v410_v34, %v137_v42  ;;  %v159_v17 = vmax.f32 %v422_v41, 0.0 }
 0x11a   :  { %v171_v45 = vsub.f32 0.0, %v165_v43  ;;  %152 = vst.msk [vmem:[%s525_s5 + $0x8] sm:$0xff] %vm150_vm3, %v431_v44  ;;  %v164_v46 = vand.u32 2147483647, %v431_v44  ;;  %v158_v30 = vmax.f32 %v431_v44, 0.0 }
 0x11c   :  { %v179_v47 = vmul.f32 1.442695, %v171_v45  ;;  %v170_v48 = vsub.f32 0.0, %v164_v46 }
 0x11d   :  { %v142_v49 = vpop.f32.mrf.mxu1 }
 0x11e   :  { %v315_v50 = vpop.eup %314  ;;  %316 = vpow2.f32 %v179_v47  ;;  %v177_v51 = vmul.f32 1.442695, %v170_v48  ;;  %v440_v52 = vadd.f32 %v410_v34, %v142_v49 }
 0x11f   :  { %v187_v53 = vadd.f32 1.0, %v315_v50  ;;  %v190_v54 = vmul.f32 -0.5, %v315_v50  ;;  %v193_v58 = vand.u32 2147483647, %v315_v50 }
 0x120   :  { %318 = vpow2.f32 %v177_v51  ;;  %154 = vst.msk [vmem:[%s525_s5 + $0x18] sm:$0xff] %vm150_vm3, %v440_v52  ;;  %v166_v55 = vand.u32 2147483647, %v440_v52  ;;  %v160_v49 = vmax.f32 %v440_v52, 0.0 }
 0x121   :  { %320 = vlog2.f32 %v187_v53  ;;  %v191_v56 = vadd.f32 1.0, %v190_v54  ;;  %vm194_vm4 = vcmp.lt.f32.partialorder %v193_v58, 0.0004427343 }
 0x122   :  { %v172_v57 = vsub.f32 0.0, %v166_v55 }
 0x123   :  { %v192_v0 = vmul.f32 %v315_v50, %v191_v56 }
 0x124   :  { %v317_v59 = vpop.eup %316  ;;  %v181_v60 = vmul.f32 1.442695, %v172_v57 }
 0x125   :  { %v205_v61 = vadd.f32 1.0, %v317_v59  ;;  %v208_v62 = vmul.f32 -0.5, %v317_v59  ;;  %v211_v10 = vand.u32 2147483647, %v317_v59 }
 0x126   :  { %v319_v63 = vpop.eup %318  ;;  %322 = vpow2.f32 %v181_v60 }
 0x127   :  { %v321_v1 = vpop.eup %320  ;;  %324 = vlog2.f32 %v205_v61  ;;  %v196_v2 = vadd.f32 1.0, %v319_v63  ;;  %v199_v4 = vmul.f32 -0.5, %v319_v63  ;;  %v209_v6 = vadd.f32 1.0, %v208_v62 }
 0x128   :  { %v189_v3 = vmul.f32 0.6931472, %v321_v1  ;;  %v202_v11 = vand.u32 2147483647, %v319_v63  ;;  %vm212_vm7 = vcmp.lt.f32.partialorder %v211_v10, 0.0004427343 }
 0x129   :  { %326 = vlog2.f32 %v196_v2  ;;  %v200_v8 = vadd.f32 1.0, %v199_v4  ;;  %v210_v18 = vmul.f32 %v317_v59, %v209_v6 }
 0x12a   :  { %v195_v7 = vsel %vm194_vm4, %v192_v0, %v189_v3  ;;  %vm203_vm8 = vcmp.lt.f32.partialorder %v202_v11, 0.0004427343 }
 0x12b   :  { %v241_v9 = vadd.f32 %v195_v7, %v157_v5  ;;  %v145_v12 = vpop.f32.mrf.mxu2  ;;  %v201_v21 = vmul.f32 %v319_v63, %v200_v8 }
 0x12c   :  { %v323_v13 = vpop.eup %322  ;;  %v450_v14 = vadd.f32 %v410_v34, %v145_v12 }
 0x12d   :  { %v325_v15 = vpop.eup %324  ;;  %v247_v16 = vmul.f32 0.9, %v241_v9  ;;  %v214_v19 = vadd.f32 1.0, %v323_v13  ;;  %v217_v22 = vmul.f32 -0.5, %v323_v13  ;;  %v220_v38 = vand.u32 2147483647, %v323_v13 }
 0x12e   :  { %v207_v20 = vmul.f32 0.6931472, %v325_v15  ;;  %155 = vst.msk [vmem:[%s525_s5 + $0x20] sm:$0xff] %vm150_vm3, %v450_v14  ;;  %v167_v23 = vand.u32 2147483647, %v450_v14  ;;  %v161_v1 = vmax.f32 %v450_v14, 0.0 }
 0x12f   :  { %v327_v24 = vpop.eup %326  ;;  %v253_v25 = vadd.f32 0.1, %v247_v16  ;;  %328 = vlog2.f32 %v214_v19  ;;  %v218_v32 = vadd.f32 1.0, %v217_v22  ;;  %vm221_vm9 = vcmp.lt.f32.partialorder %v220_v38, 0.0004427343 }
 0x130   :  { %v213_v26 = vsel %vm212_vm7, %v210_v18, %v207_v20  ;;  %v198_v27 = vmul.f32 0.6931472, %v327_v24  ;;  %v173_v28 = vsub.f32 0.0, %v167_v23 }
 0x131   :  { %260 = vst.msk [vmem:[%s525_s5] sm:$0xff] %vm259_vm5, %v253_v25  ;;  %v243_v29 = vadd.f32 %v213_v26, %v159_v17  ;;  %v219_v47 = vmul.f32 %v323_v13, %v218_v32 }
 0x132   :  { %267 = vst.msk [vmem:[%s525_s5] sm:$0xff] %vm266_vm6, %v413_v36  ;;  %v204_v31 = vsel %vm203_vm8, %v201_v21, %v198_v27  ;;  %v183_v33 = vmul.f32 1.442695, %v173_v28 }
 0x133   :  { %v249_v35 = vmul.f32 0.9, %v243_v29  ;;  %v242_v37 = vadd.f32 %v204_v31, %v158_v30  ;;  %v147_v39 = vpop.f32.mrf.mxu2 }
 0x134   :  { %330 = vpow2.f32 %v183_v33  ;;  %v148_v40 = vadd.f32 %v410_v34, %v147_v39 }
 0x135   :  { %v329_v42 = vpop.eup %328  ;;  %v255_v43 = vadd.f32 0.1, %v249_v35  ;;  %v248_v45 = vmul.f32 0.9, %v242_v37 }
 0x136   :  { %v216_v46 = vmul.f32 0.6931472, %v329_v42  ;;  %156 = vst.msk [vmem:[%s525_s5 + $0x28] sm:$0xff] %vm150_vm3, %v148_v40  ;;  %v168_v36 = vand.u32 2147483647, %v148_v40  ;;  %v162_v10 = vmax.f32 %v148_v40, 0.0 }
 0x137   :  { %262 = vst.msk [vmem:[%s525_s5 + $0x10] sm:$0xff] %vm259_vm5, %v255_v43  ;;  %v254_v48 = vadd.f32 0.1, %v248_v45 }
 0x138   :  { %269 = vst.msk [vmem:[%s525_s5 + $0x10] sm:$0xff] %vm266_vm6, %v422_v41  ;;  %v222_v34 = vsel %vm221_vm9, %v219_v47, %v216_v46  ;;  %v174_v50 = vsub.f32 0.0, %v168_v36 }
 0x139   :  { %261 = vst.msk [vmem:[%s525_s5 + $0x8] sm:$0xff] %vm259_vm5, %v254_v48  ;;  %v244_v51 = vadd.f32 %v222_v34, %v160_v49 }
 0x13a   :  { %v331_v53 = vpop.eup %330  ;;  %268 = vst.msk [vmem:[%s525_s5 + $0x8] sm:$0xff] %vm266_vm6, %v431_v44  ;;  %v185_v54 = vmul.f32 1.442695, %v174_v50 }
 0x13b   :  { %v250_v55 = vmul.f32 0.9, %v244_v51  ;;  %v223_v56 = vadd.f32 1.0, %v331_v53  ;;  %v226_v57 = vmul.f32 -0.5, %v331_v53  ;;  %v229_v44 = vand.u32 2147483647, %v331_v53 }
 0x13c   :  { %332 = vpow2.f32 %v185_v54 }
 0x13d   :  { %v256_v41 = vadd.f32 0.1, %v250_v55  ;;  %334 = vlog2.f32 %v223_v56  ;;  %v227_v58 = vadd.f32 1.0, %v226_v57  ;;  %vm230_vm10 = vcmp.lt.f32.partialorder %v229_v44, 0.0004427343 }
 0x13f   :  { %263 = vst.msk [vmem:[%s525_s5 + $0x18] sm:$0xff] %vm259_vm5, %v256_v41  ;;  %v228_v63 = vmul.f32 %v331_v53, %v227_v58 }
 0x140   :  { %270 = vst.msk [vmem:[%s525_s5 + $0x18] sm:$0xff] %vm266_vm6, %v440_v52 }
 0x142   :  { %v333_v59 = vpop.eup %332 }
 0x143   :  { %v335_v60 = vpop.eup %334  ;;  %v232_v61 = vadd.f32 1.0, %v333_v59  ;;  %v235_v0 = vmul.f32 -0.5, %v333_v59  ;;  %v238_v6 = vand.u32 2147483647, %v333_v59 }
 0x144   :  { %v225_v62 = vmul.f32 0.6931472, %v335_v60 }
 0x145   :  { %336 = vlog2.f32 %v232_v61  ;;  %v236_v4 = vadd.f32 1.0, %v235_v0  ;;  %vm239_vm11 = vcmp.lt.f32.partialorder %v238_v6, 0.0004427343 }
 0x146   :  { %v231_v2 = vsel %vm230_vm10, %v228_v63, %v225_v62 }
 0x147   :  { %v245_v3 = vadd.f32 %v231_v2, %v161_v1  ;;  %v237_v9 = vmul.f32 %v333_v59, %v236_v4 }
 0x149   :  { %v251_v5 = vmul.f32 0.9, %v245_v3 }
 0x14b   :  { %v337_v7 = vpop.eup %336  ;;  %v257_v8 = vadd.f32 0.1, %v251_v5 }
 0x14c   :  { %v234_v52 = vmul.f32 0.6931472, %v337_v7 }
 0x14d   :  { %264 = vst.msk [vmem:[%s525_s5 + $0x20] sm:$0xff] %vm259_vm5, %v257_v8 }
 0x14e   :  { %271 = vst.msk [vmem:[%s525_s5 + $0x20] sm:$0xff] %vm266_vm6, %v450_v14  ;;  %v240_v11 = vsel %vm239_vm11, %v237_v9, %v234_v52 }
 0x14f   :  { %v246_v12 = vadd.f32 %v240_v11, %v162_v10 }
 0x151   :  { %v252_v13 = vmul.f32 0.9, %v246_v12 }
 0x153   :  { %v258_v15 = vadd.f32 0.1, %v252_v13 }
 0x155   :  { %265 = vst.msk [vmem:[%s525_s5 + $0x28] sm:$0xff] %vm259_vm5, %v258_v15 }
 0x156   :  { %272 = vst.msk [vmem:[%s525_s5 + $0x28] sm:$0xff] %vm266_vm6, %v148_v40 }

</bundles_post_ra>
